<compile_context>
chip_gen: v7x
topology: tpu7x:2x2x1
jax: 0.10.0
libtpu: 0.0.40
codegen_flags: <defaults>
</compile_context>

<pallas_src>
import functools

import jax
import jax.numpy as jnp
from jax.experimental import pallas as pl
from jax.experimental.pallas import tpu as pltpu


def _make_bypass_dma_kernel(num_chunks: int, chunk_rows: int):
    """Kernel issuing `num_chunks` concurrent HBM->HBM DMAs, then waiting all."""

    def kernel(x_hbm_ref, o_hbm_ref, copy_sems):
        copies = []
        for i in range(num_chunks):            # static unroll: start all DMAs
            sl = pl.ds(i * chunk_rows, chunk_rows)
            cp = pltpu.make_async_copy(
                x_hbm_ref.at[sl], o_hbm_ref.at[sl], copy_sems.at[i]
            )
            cp.start()
            copies.append(cp)
        for cp in copies:                      # then wait all (max overlap)
            cp.wait()

    return kernel


@functools.partial(jax.jit, static_argnames=("num_chunks", "chunk_rows"))
def _materialize_copy(x, *, num_chunks: int, chunk_rows: int):
    return pl.pallas_call(
        _make_bypass_dma_kernel(num_chunks, chunk_rows),
        out_shape=jax.ShapeDtypeStruct(x.shape, x.dtype),
        in_specs=[pl.BlockSpec(memory_space=pl.ANY)],   # stay in HBM, no auto-DMA
        out_specs=pl.BlockSpec(memory_space=pl.ANY),    # stay in HBM, write via DMA
        scratch_shapes=[pltpu.SemaphoreType.DMA((num_chunks,))],
    )(x)


def pretrained_feature_map(x_list, feature_idx: int = -1, materialize: bool = False):
    """Pallas implementation of PretrainedFeatureMap.forward.

    Args:
        x_list: list of jnp arrays (e.g. NCHW feature maps from a backbone).
        feature_idx: which feature map to bypass (static, like the nn.Module).
        materialize: if False (default, matching the PyTorch bypass exactly),
            return x_list[feature_idx] directly -- zero cost, zero HBM traffic.
            If True, produce a fresh buffer via concurrent HBM->HBM DMAs.
            NOTE: the default returns an *alias* of the input; callers that
            donate/mutate the result should set materialize=True.

    Returns:
        x_list[feature_idx] (or a fresh copy of it produced by the kernel).
    """
    x = x_list[feature_idx]  # list selection = Python glue, not compute
    if not materialize:
        # Fastest possible path on every generation: no kernel, no copy.
        return x

    # Pick a static chunk count for concurrent DMAs.  Only worth it for
    # multi-MB maps; tiny maps keep a single DMA (per-descriptor overhead).
    nbytes = x.size * jnp.dtype(x.dtype).itemsize
    leading = x.shape[0] if x.ndim >= 1 else 1
    num_chunks = 1
    if nbytes >= (2 << 20):  # >= 2 MiB
        for cand in (8, 4, 2):
            if leading % cand == 0:
                num_chunks = cand
                break
    chunk_rows = max(leading // num_chunks, 1)

    return _materialize_copy(x, num_chunks=num_chunks, chunk_rows=chunk_rows)


if __name__ == "__main__":
    key = jax.random.PRNGKey(0)
    k0, k1, k2 = jax.random.split(key, 3)

    # Synthetic "features_only" backbone output: a pyramid of feature maps.
    feats = [
        jax.random.normal(k0, (2, 4, 16, 16), dtype=jnp.float32),
        jax.random.normal(k1, (2, 8, 8, 8), dtype=jnp.float32),
        jax.random.normal(k2, (2, 16, 4, 4), dtype=jnp.float32),
    ]

    feature_idx = -1  # default of the PyTorch module
    ref = feats[feature_idx]

    # Kernel path (materialized copy via HBM->HBM DMA(s)).
    out = pretrained_feature_map(feats, feature_idx, materialize=True)
    out = jax.block_until_ready(out)
    assert out.shape == ref.shape, (out.shape, ref.shape)
    assert out.dtype == ref.dtype, (out.dtype, ref.dtype)
    assert jnp.array_equal(out, ref), "Pallas bypass does not match reference"

    # Default zero-copy path (exactly the PyTorch bypass semantics).
    out2 = pretrained_feature_map(feats, feature_idx)
    out2 = jax.block_until_ready(out2)
    assert jnp.array_equal(out2, ref)

    print("KERNEL_OK")
</pallas_src>

<mosaic_0001>
module attributes {stable_mosaic.version = 11 : i64} {
  func.func @kernel(%arg0: memref<2x16x4x4xf32, #tpu.memory_space<any>>, %arg1: memref<2x16x4x4xf32, #tpu.memory_space<any>>, %arg2: memref<1x!tpu.dma_semaphore, #tpu.memory_space<semaphore_mem>>) attributes {dimension_semantics = [], scalar_prefetch = 0 : i64, scratch_operands = 1 : i64, tpu.core_type = #tpu.core_type<tc>} {
    %c0_i32 = arith.constant 0 : i32
    %c0_i32_0 = arith.constant 0 : i32
    %c0_i32_1 = arith.constant 0 : i32
    %c0_i32_2 = arith.constant 0 : i32
    %c0_i32_3 = arith.constant 0 : i32
    %0 = tpu.memref_slice %arg0[%c0_i32_0, %c0_i32_1, %c0_i32_2, %c0_i32_3] : memref<2x16x4x4xf32, #tpu.memory_space<any>> -> memref<2x16x4x4xf32, #tpu.memory_space<any>>
    %c0_i32_4 = arith.constant 0 : i32
    %c0_i32_5 = arith.constant 0 : i32
    %c0_i32_6 = arith.constant 0 : i32
    %c0_i32_7 = arith.constant 0 : i32
    %1 = tpu.memref_slice %arg1[%c0_i32_4, %c0_i32_5, %c0_i32_6, %c0_i32_7] : memref<2x16x4x4xf32, #tpu.memory_space<any>> -> memref<2x16x4x4xf32, #tpu.memory_space<any>>
    %2 = tpu.memref_slice %arg2[%c0_i32] : memref<1x!tpu.dma_semaphore, #tpu.memory_space<semaphore_mem>> -> memref<1x!tpu.dma_semaphore, #tpu.memory_space<semaphore_mem>>
    %3 = tpu.memref_squeeze %2 : memref<1x!tpu.dma_semaphore, #tpu.memory_space<semaphore_mem>> -> memref<!tpu.dma_semaphore, #tpu.memory_space<semaphore_mem>>
    tpu.enqueue_dma source(%0 : memref<2x16x4x4xf32, #tpu.memory_space<any>>) target(%1 : memref<2x16x4x4xf32, #tpu.memory_space<any>>) target_semaphore(%3 : memref<!tpu.dma_semaphore, #tpu.memory_space<semaphore_mem>>)
    %c0_i32_8 = arith.constant 0 : i32
    %c0_i32_9 = arith.constant 0 : i32
    %c0_i32_10 = arith.constant 0 : i32
    %c0_i32_11 = arith.constant 0 : i32
    %c0_i32_12 = arith.constant 0 : i32
    %4 = tpu.memref_slice %arg0[%c0_i32_9, %c0_i32_10, %c0_i32_11, %c0_i32_12] : memref<2x16x4x4xf32, #tpu.memory_space<any>> -> memref<2x16x4x4xf32, #tpu.memory_space<any>>
    %c0_i32_13 = arith.constant 0 : i32
    %c0_i32_14 = arith.constant 0 : i32
    %c0_i32_15 = arith.constant 0 : i32
    %c0_i32_16 = arith.constant 0 : i32
    %5 = tpu.memref_slice %arg1[%c0_i32_13, %c0_i32_14, %c0_i32_15, %c0_i32_16] : memref<2x16x4x4xf32, #tpu.memory_space<any>> -> memref<2x16x4x4xf32, #tpu.memory_space<any>>
    %6 = tpu.memref_slice %arg2[%c0_i32_8] : memref<1x!tpu.dma_semaphore, #tpu.memory_space<semaphore_mem>> -> memref<1x!tpu.dma_semaphore, #tpu.memory_space<semaphore_mem>>
    %7 = tpu.memref_squeeze %6 : memref<1x!tpu.dma_semaphore, #tpu.memory_space<semaphore_mem>> -> memref<!tpu.dma_semaphore, #tpu.memory_space<semaphore_mem>>
    tpu.wait_dma2 semaphore(%7 : memref<!tpu.dma_semaphore, #tpu.memory_space<semaphore_mem>>) src(%4 : memref<2x16x4x4xf32, #tpu.memory_space<any>>) dst(%5 : memref<2x16x4x4xf32, #tpu.memory_space<any>>)
    return
  }
}

</mosaic_0001>

<bundles_post_ra>
// kernel: _materialize_copy.1
= control target key start
LH: loop header
LB: loop body
LE: loop exit
PB: predicated region body
PF: predicated region fallthrough
CT: control target
= control target key end

     0   :  { %s206_s0 = inlined_call_operand.vmem [shape: f32[2,16,4,4], index: 0, kind: input, shape index: {}]   ;;  %s207_s1 = inlined_call_operand.vmem [shape: f32[2,16,4,4], index: 1, kind: output, shape index: {}]  }
   0x1   :  { %v38_v0 = vld [vmem:[%s206_s0] sm:$0xff]  ;;  %v40_v1 = vld [vmem:[%s206_s0 + $0x8] sm:$0xff]  ;;  %v42_v2 = vld [vmem:[%s206_s0 + $0x10] sm:$0xff] }
   0x2   :  { %39 = vst [vmem:[%s207_s1] sm:$0xff] %v38_v0  ;;  %41 = vst [vmem:[%s207_s1 + $0x8] sm:$0xff] %v40_v1  ;;  %v44_v3 = vld [vmem:[%s206_s0 + $0x18] sm:$0xff]  ;;  %v46_v4 = vld [vmem:[%s206_s0 + $0x20] sm:$0xff] }
   0x3   :  { %43 = vst [vmem:[%s207_s1 + $0x10] sm:$0xff] %v42_v2  ;;  %v48_v5 = vld [vmem:[%s206_s0 + $0x28] sm:$0xff]  ;;  %45 = vst [vmem:[%s207_s1 + $0x18] sm:$0xff] %v44_v3  ;;  %v50_v6 = vld [vmem:[%s206_s0 + $0x30] sm:$0xff] }
   0x4   :  { %47 = vst [vmem:[%s207_s1 + $0x20] sm:$0xff] %v46_v4  ;;  %49 = vst [vmem:[%s207_s1 + $0x28] sm:$0xff] %v48_v5  ;;  %v52_v7 = vld [vmem:[%s206_s0 + $0x38] sm:$0xff]  ;;  %v54_v8 = vld [vmem:[%s206_s0 + $0x40] sm:$0xff] }
   0x5   :  { %51 = vst [vmem:[%s207_s1 + $0x30] sm:$0xff] %v50_v6  ;;  %53 = vst [vmem:[%s207_s1 + $0x38] sm:$0xff] %v52_v7  ;;  %v56_v9 = vld [vmem:[%s206_s0 + $0x48] sm:$0xff]  ;;  %v58_v10 = vld [vmem:[%s206_s0 + $0x50] sm:$0xff] }
   0x6   :  { %55 = vst [vmem:[%s207_s1 + $0x40] sm:$0xff] %v54_v8  ;;  %v60_v11 = vld [vmem:[%s206_s0 + $0x58] sm:$0xff]  ;;  %57 = vst [vmem:[%s207_s1 + $0x48] sm:$0xff] %v56_v9  ;;  %v62_v12 = vld [vmem:[%s206_s0 + $0x60] sm:$0xff] }
   0x7   :  { %59 = vst [vmem:[%s207_s1 + $0x50] sm:$0xff] %v58_v10  ;;  %61 = vst [vmem:[%s207_s1 + $0x58] sm:$0xff] %v60_v11  ;;  %v64_v13 = vld [vmem:[%s206_s0 + $0x68] sm:$0xff]  ;;  %v66_v14 = vld [vmem:[%s206_s0 + $0x70] sm:$0xff] }
   0x8   :  { %63 = vst [vmem:[%s207_s1 + $0x60] sm:$0xff] %v62_v12  ;;  %65 = vst [vmem:[%s207_s1 + $0x68] sm:$0xff] %v64_v13  ;;  %v68_v15 = vld [vmem:[%s206_s0 + $0x78] sm:$0xff] }
   0x9   :  { %67 = vst [vmem:[%s207_s1 + $0x70] sm:$0xff] %v66_v14  ;;  %69 = vst [vmem:[%s207_s1 + $0x78] sm:$0xff] %v68_v15 }
   0xa   :  { %77 = vsyncadd [#allocation2], 2048 }
   0xb   :  { %98 = dma.done.wait [#allocation2], 2048 }
   0xc   :  { %99 = vsyncadd [#allocation2], 4294965248 }
   0xd   :  { %83 = vsyncmov [#allocation2] }
  0x10   :  { %s84_s12 = vpop.sfrf %83 }
  0x11   :  { %p97_p0 = scmp.ne.s32.totalorder %s84_s12, 0 }
  0x13   :  { %88 = shalt.err (%p97_p0)  }

</bundles_post_ra>
